<compile_context>
chip_gen: v7x
topology: tpu7x:2x2x1
jax: 0.10.0
libtpu: 0.0.40
codegen_flags: <defaults>
</compile_context>

<pallas_src>
import jax
import jax.numpy as jnp
from jax.experimental import pallas as pl
from jax.experimental.pallas import tpu as pltpu


def _cdiv(a, b):
    return -(-a // b)


def _round_up(a, m):
    return _cdiv(a, m) * m


def _linear_kernel(xt_ref, w_ref, b_ref, o_ref):
    # xt_ref: (in_f, TR, C) VMEM tile  (features major, batch folded to (TR, C))
    # w_ref:  (in_f,) SMEM float32 scalars
    # b_ref:  (1,)    SMEM float32 scalar
    # o_ref:  (TR, C) VMEM tile        (sublane+lane dense -> unmasked stores)
    in_f = xt_ref.shape[0]
    # Bias folded into the init; accumulate in float32.
    acc = xt_ref[0].astype(jnp.float32) * w_ref[0] + b_ref[0]
    for k in range(1, in_f):                       # static, unrolled (in_f == 3)
        acc = acc + xt_ref[k].astype(jnp.float32) * w_ref[k]
    o_ref[...] = acc.astype(o_ref.dtype)


def linear_forward(x, weight, bias, *, lane_cols=512, max_block_rows=512):
    """y = x @ weight.T + bias   (PyTorch nn.Linear(3, 1) forward semantics).

    x:      (B, in_features)             float
    weight: (out_features, in_features)  PyTorch layout (out_features == 1)
    bias:   (out_features,)
    """
    B, in_f = x.shape
    out_f = weight.shape[0]
    assert out_f == 1, "module is nn.Linear(3, 1)"
    assert lane_cols % 128 == 0

    C = lane_cols
    Bp = _round_up(B, C)             # pad only to the lane fold, never to a tile
    R = Bp // C

    # Feature-major fold: (B, in_f) -> (in_f, R, C).  The reshape after the
    # transpose is free (row-major); the pad is at most C-1 rows (a few KiB).
    xt = x.T
    if Bp != B:
        xt = jnp.pad(xt, ((0, 0), (0, Bp - B)))
    xt = xt.reshape(in_f, R, C)

    # Row tile: multiple of 8 sublanes, capped so the double-buffered VMEM
    # footprint (~2 * (in_f+1) * TR * C * 4B) stays small on every generation,
    # and split so the grid has >= 2 blocks when possible (v7x megacore).
    if R <= 8:
        tr = R
    else:
        tr = max(8, min(max_block_rows, _round_up(_cdiv(R, 2), 8)))
    grid = (_cdiv(R, tr),)           # ragged last block handled by Pallas

    w_vec = weight.reshape(in_f).astype(jnp.float32)     # SMEM scalars
    b_vec = bias.reshape(1).astype(jnp.float32)          # SMEM scalar

    itemsize = jnp.dtype(x.dtype).itemsize
    cost = pl.CostEstimate(
        flops=2 * in_f * Bp,
        transcendentals=0,
        bytes_accessed=(in_f + 1) * Bp * itemsize,
    )

    yt = pl.pallas_call(
        _linear_kernel,
        out_shape=jax.ShapeDtypeStruct((R, C), x.dtype),
        grid=grid,
        in_specs=[
            pl.BlockSpec((in_f, tr, C), lambda i: (0, i, 0)),
            pl.BlockSpec(memory_space=pltpu.MemorySpace.SMEM),
            pl.BlockSpec(memory_space=pltpu.MemorySpace.SMEM),
        ],
        out_specs=pl.BlockSpec((tr, C), lambda i: (i, 0)),
        compiler_params=pltpu.CompilerParams(
            dimension_semantics=("parallel",),
            vmem_limit_bytes=32 * 1024 * 1024,
        ),
        cost_estimate=cost,
    )(xt, w_vec, b_vec)

    # Unfold, drop the padded tail, restore (B, out_features).
    return yt.reshape(Bp)[:B].reshape(B, out_f)


if __name__ == "__main__":
    key = jax.random.PRNGKey(0)
    kx, kw, kb = jax.random.split(key, 3)

    in_features, out_features = 3, 1
    weight = jax.random.normal(kw, (out_features, in_features), dtype=jnp.float32)
    bias = jax.random.normal(kb, (out_features,), dtype=jnp.float32)

    # Small demo batch consistent with the module.
    batch = 8
    x = jax.random.normal(kx, (batch, in_features), dtype=jnp.float32)
    y = linear_forward(x, weight, bias)
    y = jax.block_until_ready(y)
    y_ref = x @ weight.T + bias
    assert y.shape == (batch, out_features)
    assert jnp.allclose(y, y_ref, atol=1e-5, rtol=1e-5)

    # Second check: exercises multi-block grid + ragged last block.
    batch2 = 5000
    x2 = jax.random.normal(kx, (batch2, in_features), dtype=jnp.float32)
    y2 = jax.block_until_ready(linear_forward(x2, weight, bias))
    y2_ref = x2 @ weight.T + bias
    assert y2.shape == (batch2, out_features)
    assert jnp.allclose(y2, y2_ref, atol=1e-5, rtol=1e-5)

    print("KERNEL_OK")
</pallas_src>

<mosaic_0001>
module attributes {stable_mosaic.version = 11 : i64} {
  func.func @_linear_kernel(%arg0: i32, %arg1: memref<3x1x512xf32, #tpu.memory_space<vmem>>, %arg2: memref<3xf32, #tpu.memory_space<smem>>, %arg3: memref<1xf32, #tpu.memory_space<smem>>, %arg4: memref<1x512xf32, #tpu.memory_space<vmem>>) attributes {dimension_semantics = [#tpu.dimension_semantics<parallel>], iteration_bounds = array<i64: 1>, scalar_prefetch = 0 : i64, scratch_operands = 0 : i64, tpu.core_type = #tpu.core_type<tc>, window_params = [{transform_indices = @transform_0, window_bounds = array<i64: 3, 1, 512>}, {transform_indices = @transform_1, window_bounds = array<i64: 3>}, {transform_indices = @transform_2, window_bounds = array<i64: 1>}, {transform_indices = @transform_3, window_bounds = array<i64: 1, 512>}]} {
    %c0 = arith.constant 0 : index
    %c0_0 = arith.constant 0 : index
    %c0_1 = arith.constant 0 : index
    %0 = vector.load %arg1[%c0, %c0_0, %c0_1] : memref<3x1x512xf32, #tpu.memory_space<vmem>>, vector<1x1x512xf32>
    %1 = vector.shape_cast %0 : vector<1x1x512xf32> to vector<1x512xf32>
    %c0_2 = arith.constant 0 : index
    %2 = memref.load %arg2[%c0_2] : memref<3xf32, #tpu.memory_space<smem>>
    %3 = vector.broadcast %2 : f32 to vector<1x512xf32>
    %4 = arith.mulf %1, %3 : vector<1x512xf32>
    %c0_3 = arith.constant 0 : index
    %5 = memref.load %arg3[%c0_3] : memref<1xf32, #tpu.memory_space<smem>>
    %6 = vector.broadcast %5 : f32 to vector<1x512xf32>
    %7 = arith.addf %4, %6 : vector<1x512xf32>
    %c1 = arith.constant 1 : index
    %c0_4 = arith.constant 0 : index
    %c0_5 = arith.constant 0 : index
    %8 = vector.load %arg1[%c1, %c0_4, %c0_5] : memref<3x1x512xf32, #tpu.memory_space<vmem>>, vector<1x1x512xf32>
    %9 = vector.shape_cast %8 : vector<1x1x512xf32> to vector<1x512xf32>
    %c1_6 = arith.constant 1 : index
    %10 = memref.load %arg2[%c1_6] : memref<3xf32, #tpu.memory_space<smem>>
    %11 = vector.broadcast %10 : f32 to vector<1x512xf32>
    %12 = arith.mulf %9, %11 : vector<1x512xf32>
    %13 = arith.addf %7, %12 : vector<1x512xf32>
    %c2 = arith.constant 2 : index
    %c0_7 = arith.constant 0 : index
    %c0_8 = arith.constant 0 : index
    %14 = vector.load %arg1[%c2, %c0_7, %c0_8] : memref<3x1x512xf32, #tpu.memory_space<vmem>>, vector<1x1x512xf32>
    %15 = vector.shape_cast %14 : vector<1x1x512xf32> to vector<1x512xf32>
    %c2_9 = arith.constant 2 : index
    %16 = memref.load %arg2[%c2_9] : memref<3xf32, #tpu.memory_space<smem>>
    %17 = vector.broadcast %16 : f32 to vector<1x512xf32>
    %18 = arith.mulf %15, %17 : vector<1x512xf32>
    %19 = arith.addf %13, %18 : vector<1x512xf32>
    %c0_10 = arith.constant 0 : index
    %c0_11 = arith.constant 0 : index
    %20 = vector.load %arg4[%c0_10, %c0_11] : memref<1x512xf32, #tpu.memory_space<vmem>>, vector<1x512xf32>
    tpu.vector_store %arg4[%c0_10, %c0_11], %19 {strides = array<i32>} : memref<1x512xf32, #tpu.memory_space<vmem>>, vector<1x512xf32>,
    return
  }
  func.func @transform_0(%arg0: i32) -> (i32, i32, i32) {
    %c0_i32 = arith.constant 0 : i32
    %c0_i32_0 = arith.constant 0 : i32
    %c0_i32_1 = arith.constant 0 : i32
    return %c0_i32, %arg0, %c0_i32_0 : i32, i32, i32
  }
  func.func @transform_1(%arg0: i32) -> i32 {
    %c0_i32 = arith.constant 0 : i32
    %c0_i32_0 = arith.constant 0 : i32
    return %c0_i32 : i32
  }
  func.func @transform_2(%arg0: i32) -> i32 {
    %c0_i32 = arith.constant 0 : i32
    %c0_i32_0 = arith.constant 0 : i32
    return %c0_i32 : i32
  }
  func.func @transform_3(%arg0: i32) -> (i32, i32) {
    %c0_i32 = arith.constant 0 : i32
    %c0_i32_0 = arith.constant 0 : i32
    return %arg0, %c0_i32 : i32, i32
  }
}

</mosaic_0001>

<bundles_post_ra>
// kernel: tpu_custom_call.1
= control target key start
LH: loop header
LB: loop body
LE: loop exit
PB: predicated region body
PF: predicated region fallthrough
CT: control target
= control target key end

     0   :  { %9 = vsyncpa [#allocation4], 0  ;;  %s207_s0 = inlined_call_operand.hbm [shape: f32[3,1,512], index: 0, kind: input, shape index: {}]   ;;  %s208_s1 = inlined_call_operand.vmem [shape: f32[3], index: 1, kind: input, shape index: {}]   ;;  %s209_s2 = inlined_call_operand.<no memory space> [shape: f32[1], index: 2, kind: input, shape index: {}]   ;;  %s210_s3 = inlined_call_operand.hbm [shape: f32[1,512], index: 3, kind: output, shape index: {}]  }
   0x1   :  { %10 = vsyncpa [#allocation6], 0 }
   0x2   :  { %11 = vsyncpa [#allocation5], 0  ;;  %s152_s12 = smov [#allocation3]   ;;  %s30_s16 = sshll.u32 %s208_s1, 4  ;;  %s31_s16 = int_to_ptr.vmem [resolvable:$true] %s30_s16 }
   0x3   :  { %s17_s13 = sshll.u32 %s152_s12, 4  ;;  %s90_s19 = scalar_lea.hbm %s207_s0, 192  ;;  %s18_s13 = int_to_ptr.vmem [resolvable:$true] %s17_s13 }
   0x4   :  { %p91_p0 = scmp.ne.s32.totalorder %s207_s0, %s90_s19  ;;  %p94_p1 = scmp.lt.u32.totalorder %s90_s19, %s207_s0 }
   0x6   :  { %p96_p2 = pnand %p94_p1, %p91_p0 }
   0x8   :  { %99 = shalt.err (!%p96_p2)
}
   0x9   :  { %s100_s24 = scalar_lea.vmem %s18_s13, 192  ;;  %p105_p4 = scmp.lt.s32.totalorder %s18_s13, %s18_s13 }
   0xa   :  { %p101_p3 = scmp.ne.s32.totalorder %s18_s13, %s100_s24  ;;  %p106_p5 = scmp.lt.s32.totalorder %s100_s24, %s100_s24 }
   0xc   :  { %p107_p6 = por %p106_p5, %p105_p4 }
   0xe   :  { %p108_p7 = pnand %p107_p6, %p101_p3 }
  0x10   :  { %111 = shalt.err (!%p108_p7)
}
  0x11   :  { %s153_s1 = smov 64   ;;  %s154_s25 = smov 4  }
  0x12   :  { %23 = dma.hbm_to_vmem [thread:$0]  %s207_s0, 192, %s18_s13, [#allocation4], %s153_s1, %s153_s1, %s154_s25  }
  0x13   :  { %s112_s28 = scalar_lea.vmem %s31_s16, 16  ;;  %p117_p9 = scmp.lt.s32.totalorder %s31_s16, %s31_s16 }
  0x14   :  { %p113_p8 = scmp.ne.s32.totalorder %s31_s16, %s112_s28  ;;  %p118_p10 = scmp.lt.s32.totalorder %s112_s28, %s112_s28 }
  0x16   :  { %p119_p11 = por %p118_p10, %p117_p9 }
  0x18   :  { %p120_p12 = pnand %p119_p11, %p113_p8 }
  0x1a   :  { %123 = shalt.err (!%p120_p12)
}
  0x1b   :  { %s155_s29 = smov [#allocation7]  }
  0x1c   :  { %33 = dma.vmem_to_smem %s31_s16, 16, %s155_s29, [#allocation6]  }
  0x1d   :  { %146 = dma.done.wait [#allocation4], 192  }
  0x1e   :  { %147 = vsyncadd [#allocation4], 4294967104 }
  0x1f   :  { %148 = dma.done.wait [#allocation6], 16  }
  0x20   :  { %149 = vsyncadd [#allocation6], 4294967280 }
  0x21   :  { %42 = sfence }
  0x22   :  { %s44_s30 = sld [smem:[#allocation7]]  ;;  %s83_s4 = sld [smem:[#allocation7 + $0x1]]  ;;  %v43_v0 = vld [vmem:[#allocation3] sm:$0xf]  ;;  %v51_v1 = vld [vmem:[#allocation3 + $0x4] sm:$0xf]  ;;  %v48_v3 = vstv %s209_s2  ;;  %v62_v9 = vlaneseq }
  0x23   :  { %s84_s5 = sld [smem:[#allocation7 + $0x2]]  ;;  %v57_v4 = vld [vmem:[#allocation3 + $0x8] sm:$0xf]  ;;  %s156_s7 = smov [#allocation8]  }
  0x24   :  { %s73_s8 = sshll.u32 %s156_s7, 4  ;;  %vm64_vm0 = vcmp.lt.s32.totalorder %v62_v9, 512  ;;  %s74_s8 = int_to_ptr.vmem [resolvable:$true] %s73_s8 }
  0x25   :  { %s124_s9 = scalar_lea.vmem %s74_s8, 64  ;;  %p129_p0 = scmp.lt.s32.totalorder %s74_s8, %s74_s8 }
  0x26   :  { %p125_p13 = scmp.ne.s32.totalorder %s74_s8, %s124_s9  ;;  %p130_p1 = scmp.lt.s32.totalorder %s124_s9, %s124_s9 }
  0x28   :  { %v45_v2 = vstv %s44_s30  ;;  %v53_v6 = vstv %s83_s4  ;;  %p131_p2 = por %p130_p1, %p129_p0 }
  0x29   :  { %v46_v5 = vmul.f32 %v45_v2, %v43_v0  ;;  %v59_v7 = vstv %s84_s5  ;;  %v54_v8 = vmul.f32 %v53_v6, %v51_v1 }
  0x2a   :  { %v60_v11 = vmul.f32 %v59_v7, %v57_v4  ;;  %p132_p3 = pnand %p131_p2, %p125_p13 }
  0x2b   :  { %v49_v10 = vadd.f32 %v48_v3, %v46_v5 }
  0x2d   :  { %v55_v12 = vadd.f32 %v54_v8, %v49_v10 }
  0x2f   :  { %v61_v13 = vadd.f32 %v60_v11, %v55_v12 }
  0x31   :  { %66 = vst.msk [vmem:[#allocation8] sm:$0xf] %vm64_vm0, %v61_v13 }
  0x32   :  { %135 = shalt.err (!%p132_p3)
}
  0x33   :  { %s136_s11 = scalar_lea.hbm %s210_s3, 64 }
  0x34   :  { %p137_p4 = scmp.ne.s32.totalorder %s210_s3, %s136_s11  ;;  %p140_p5 = scmp.lt.u32.totalorder %s136_s11, %s210_s3 }
  0x36   :  { %p142_p6 = pnand %p140_p5, %p137_p4 }
  0x38   :  { %145 = shalt.err (!%p142_p6)
}
  0x39   :  { %76 = dma.vmem_to_hbm [thread:$0]  %s74_s8, 64, %s210_s3, [#allocation5]  }
  0x3a   :  { %150 = dma.done.wait [#allocation5], 64  }
  0x3b   :  { %151 = vsyncadd [#allocation5], 4294967232 }
  0x3c   :  { %80 = vsyncpa [#allocation4], 1 }
  0x3d   :  { %81 = vsyncpa [#allocation5], 1 }
  0x3e   :  { %82 = vsyncpa [#allocation6], 1 }

</bundles_post_ra>
